<compile_context>
chip_gen: v7x
topology: tpu7x:2x2x1
jax: 0.10.0
libtpu: 0.0.40
codegen_flags: <defaults>
</compile_context>

<pallas_src>
import jax
import jax.numpy as jnp
from jax.experimental import pallas as pl
from jax.experimental.pallas import tpu as pltpu


def _all3_fused_kernel(x_ref, w_ref, b_ref, h_ref, hb_ref,
                       feat_ref, pred_ref, *, num_classes):
    """One fused trunk matmul + one block-diagonal head matmul.

    x_ref    : [B, K_pad]            (K zero-padded to a lane multiple)
    w_ref    : [K_pad, 3*d_model]    (W0 | W1 | W2, zero-padded rows)
    b_ref    : [1, 3*d_model]        (b0 | b1 | b2)
    h_ref    : [3*d_model, 3*nc]     block-diag(H0, H1, H2)
    hb_ref   : [1, 3*nc]             (hb0 | hb1 | hb2)
    feat_ref : [B, 3*d_model]        (feat_c | feat_g | feat_f)
    pred_ref : [B, P_pad]            (pred_c | pred_g | pred_f | combined | 0)
    """
    x = x_ref[...]

    # Fused encoder trunks: one wide MXU push instead of three.
    feat = jnp.dot(x, w_ref[...], preferred_element_type=jnp.float32)
    feat = jnp.maximum(feat + b_ref[...], 0.0)           # [B, 3*d_model]
    feat_ref[...] = feat

    # Fused heads via block-diagonal H_all: one MXU push instead of three.
    pred = jnp.dot(feat, h_ref[...], preferred_element_type=jnp.float32)
    pred = pred + hb_ref[...]                             # [B, 3*nc]

    nc = num_classes
    # fusion == 'ensemble': sum of the three per-encoder predictions (VPU add).
    pred_comb = pred[:, 0:nc] + pred[:, nc:2 * nc] + pred[:, 2 * nc:3 * nc]

    out = jnp.concatenate([pred, pred_comb], axis=1)      # [B, 4*nc]
    pad_cols = pred_ref.shape[1] - out.shape[1]
    if pad_cols > 0:   # pad to a lane-dense (multiple-of-128) output slab
        out = jnp.concatenate(
            [out, jnp.zeros((out.shape[0], pad_cols), out.dtype)], axis=1)
    pred_ref[...] = out


def all3_model_mosei(x, params):
    """x: [B, D_in] f32.  params: dict with per-encoder (W, b, H, hb)."""
    B, d_in = x.shape
    d_model = params["W0"].shape[1]
    nc = params["H0"].shape[1]

    # ---- pack parameters into fused, lane-dense slabs (wrapper-side) ----
    k_pad = max(128, ((d_in + 127) // 128) * 128)         # pad K to lane multiple
    x_pad = jnp.pad(x, ((0, 0), (0, k_pad - d_in)))

    w_all = jnp.concatenate([params["W0"], params["W1"], params["W2"]], axis=1)
    w_all = jnp.pad(w_all, ((0, k_pad - d_in), (0, 0)))   # [k_pad, 3*d_model]
    b_all = jnp.concatenate([params["b0"], params["b1"], params["b2"]], axis=1)

    h_all = jnp.zeros((3 * d_model, 3 * nc), jnp.float32)  # block-diagonal heads
    for i in range(3):
        h_all = h_all.at[i * d_model:(i + 1) * d_model,
                         i * nc:(i + 1) * nc].set(params[f"H{i}"])
    hb_all = jnp.concatenate([params["hb0"], params["hb1"], params["hb2"]], axis=1)

    pred_pad = max(128, ((4 * nc + 127) // 128) * 128)     # lane-dense pred slab

    vmem_spec = pl.BlockSpec(memory_space=pltpu.MemorySpace.VMEM)

    out_shapes = (
        jax.ShapeDtypeStruct((B, 3 * d_model), jnp.float32),  # feature slab
        jax.ShapeDtypeStruct((B, pred_pad), jnp.float32),     # pred slab (padded)
    )

    flops = 2 * B * (k_pad * 3 * d_model + 3 * d_model * 3 * nc)
    bytes_accessed = 4 * (x_pad.size + w_all.size + b_all.size + h_all.size
                          + hb_all.size + B * 3 * d_model + B * pred_pad)

    kernel = lambda *refs: _all3_fused_kernel(*refs, num_classes=nc)

    feat_slab, pred_slab = pl.pallas_call(
        kernel,
        out_shape=out_shapes,
        in_specs=[vmem_spec] * 5,
        out_specs=(vmem_spec, vmem_spec),
        cost_estimate=pl.CostEstimate(
            flops=flops, transcendentals=0, bytes_accessed=bytes_accessed),
    )(x_pad, w_all, b_all, h_all, hb_all)

    # ---- slice the two lane-dense slabs back into the module's output dict ----
    feat_c = feat_slab[:, 0:d_model]
    feat_g = feat_slab[:, d_model:2 * d_model]
    feat_f = feat_slab[:, 2 * d_model:3 * d_model]
    pred_c = pred_slab[:, 0:nc]
    pred_g = pred_slab[:, nc:2 * nc]
    pred_f = pred_slab[:, 2 * nc:3 * nc]
    pred_comb = pred_slab[:, 3 * nc:4 * nc]

    return {
        "preds": {"c": pred_c, "g": pred_g, "f": pred_f, "combined": pred_comb},
        "features": {"c": feat_c, "g": feat_g, "f": feat_f},
    }


def _reference(x, params):
    """Pure-JAX reference for correctness check."""
    def enc(W, b, H, hb):
        feat = jnp.maximum(x @ W + b, 0.0)
        pred = feat @ H + hb
        return feat, pred

    fc, pc = enc(params["W0"], params["b0"], params["H0"], params["hb0"])
    fg, pg = enc(params["W1"], params["b1"], params["H1"], params["hb1"])
    ff, pf = enc(params["W2"], params["b2"], params["H2"], params["hb2"])
    return {
        "preds": {"c": pc, "g": pg, "f": pf, "combined": pc + pg + pf},
        "features": {"c": fc, "g": fg, "f": ff},
    }


def _init_params(key, d_in, d_model, num_classes):
    keys = jax.random.split(key, 12)
    p = {}
    for i in range(3):
        kw, kb, kh, khb = keys[4 * i: 4 * i + 4]
        p[f"W{i}"] = (jax.random.normal(kw, (d_in, d_model), jnp.float32)
                      * (1.0 / jnp.sqrt(d_in)))
        p[f"b{i}"] = jax.random.normal(kb, (1, d_model), jnp.float32) * 0.02
        p[f"H{i}"] = (jax.random.normal(kh, (d_model, num_classes), jnp.float32)
                      * (1.0 / jnp.sqrt(d_model)))
        p[f"hb{i}"] = jax.random.normal(khb, (1, num_classes), jnp.float32) * 0.02
    return p


if __name__ == "__main__":
    B, D_IN, D_MODEL, NUM_CLASSES = 8, 32, 128, 8

    key = jax.random.PRNGKey(0)
    kx, kp = jax.random.split(key)
    x = jax.random.normal(kx, (B, D_IN), jnp.float32)
    params = _init_params(kp, D_IN, D_MODEL, NUM_CLASSES)

    out = all3_model_mosei(x, params)
    jax.block_until_ready(out)

    ref = _reference(x, params)
    for grp in ("preds", "features"):
        for k in ref[grp]:
            assert jnp.allclose(out[grp][k], ref[grp][k], atol=1e-4, rtol=1e-4), (grp, k)

    print("KERNEL_OK")
</pallas_src>

<mosaic_0001>
module attributes {stable_mosaic.version = 11 : i64} {
  func.func @_lambda_(%arg0: memref<8x128xf32, #tpu.memory_space<vmem>>, %arg1: memref<128x384xf32, #tpu.memory_space<vmem>>, %arg2: memref<1x384xf32, #tpu.memory_space<vmem>>, %arg3: memref<384x24xf32, #tpu.memory_space<vmem>>, %arg4: memref<1x24xf32, #tpu.memory_space<vmem>>, %arg5: memref<8x384xf32, #tpu.memory_space<vmem>>, %arg6: memref<8x128xf32, #tpu.memory_space<vmem>>) attributes {dimension_semantics = [], scalar_prefetch = 0 : i64, scratch_operands = 0 : i64, tpu.core_type = #tpu.core_type<tc>} {
    %c0 = arith.constant 0 : index
    %c0_0 = arith.constant 0 : index
    %0 = vector.load %arg0[%c0, %c0_0] : memref<8x128xf32, #tpu.memory_space<vmem>>, vector<8x128xf32>
    %c0_1 = arith.constant 0 : index
    %c0_2 = arith.constant 0 : index
    %1 = vector.load %arg1[%c0_1, %c0_2] : memref<128x384xf32, #tpu.memory_space<vmem>>, vector<128x384xf32>
    %cst = arith.constant dense<0.000000e+00> : vector<8x384xf32>
    %2 = tpu.matmul %0, %1, %cst {dimension_numbers = #tpu.dot_dimension_numbers<[1], [0], [0], [1], [0, 0, 1, 1], [], []>} : vector<8x128xf32>, vector<128x384xf32>, vector<8x384xf32> -> vector<8x384xf32>
    %c0_3 = arith.constant 0 : index
    %c0_4 = arith.constant 0 : index
    %3 = vector.load %arg2[%c0_3, %c0_4] : memref<1x384xf32, #tpu.memory_space<vmem>>, vector<1x384xf32>
    %4 = vector.broadcast %3 : vector<1x384xf32> to vector<8x384xf32>
    %5 = arith.addf %2, %4 : vector<8x384xf32>
    %cst_5 = arith.constant 0.000000e+00 : f32
    %6 = vector.broadcast %cst_5 : f32 to vector<8x384xf32>
    %7 = arith.maximumf %5, %6 : vector<8x384xf32>
    %c0_6 = arith.constant 0 : index
    %c0_7 = arith.constant 0 : index
    %8 = vector.load %arg5[%c0_6, %c0_7] : memref<8x384xf32, #tpu.memory_space<vmem>>, vector<8x384xf32>
    tpu.vector_store %arg5[%c0_6, %c0_7], %7 {strides = array<i32>} : memref<8x384xf32, #tpu.memory_space<vmem>>, vector<8x384xf32>,
    %c0_8 = arith.constant 0 : index
    %c0_9 = arith.constant 0 : index
    %9 = vector.load %arg3[%c0_8, %c0_9] : memref<384x24xf32, #tpu.memory_space<vmem>>, vector<384x24xf32>
    %cst_10 = arith.constant dense<0.000000e+00> : vector<8x24xf32>
    %10 = tpu.matmul %7, %9, %cst_10 {dimension_numbers = #tpu.dot_dimension_numbers<[1], [0], [0], [1], [0, 0, 1, 1], [], []>} : vector<8x384xf32>, vector<384x24xf32>, vector<8x24xf32> -> vector<8x24xf32>
    %c0_11 = arith.constant 0 : index
    %c0_12 = arith.constant 0 : index
    %11 = vector.load %arg4[%c0_11, %c0_12] : memref<1x24xf32, #tpu.memory_space<vmem>>, vector<1x24xf32>
    %12 = vector.broadcast %11 : vector<1x24xf32> to vector<8x24xf32>
    %13 = arith.addf %10, %12 : vector<8x24xf32>
    %14 = vector.extract_strided_slice %13 {offsets = [0, 0], sizes = [8, 8], strides = [1, 1]} : vector<8x24xf32> to vector<8x8xf32>
    %15 = vector.extract_strided_slice %13 {offsets = [0, 8], sizes = [8, 8], strides = [1, 1]} : vector<8x24xf32> to vector<8x8xf32>
    %16 = arith.addf %14, %15 : vector<8x8xf32>
    %17 = vector.extract_strided_slice %13 {offsets = [0, 16], sizes = [8, 8], strides = [1, 1]} : vector<8x24xf32> to vector<8x8xf32>
    %18 = arith.addf %16, %17 : vector<8x8xf32>
    %19 = tpu.concatenate %13, %18 in 1 : vector<8x24xf32>, vector<8x8xf32> -> vector<8x32xf32>
    %cst_13 = arith.constant 0.000000e+00 : f32
    %20 = vector.broadcast %cst_13 : f32 to vector<8x96xf32>
    %21 = tpu.concatenate %19, %20 in 1 : vector<8x32xf32>, vector<8x96xf32> -> vector<8x128xf32>
    %c0_14 = arith.constant 0 : index
    %c0_15 = arith.constant 0 : index
    %22 = vector.load %arg6[%c0_14, %c0_15] : memref<8x128xf32, #tpu.memory_space<vmem>>, vector<8x128xf32>
    tpu.vector_store %arg6[%c0_14, %c0_15], %21 {strides = array<i32>} : memref<8x128xf32, #tpu.memory_space<vmem>>, vector<8x128xf32>,
    return
  }
}

</mosaic_0001>

<bundles_post_ra>
// kernel: tpu_custom_call.1
= control target key start
LH: loop header
LB: loop body
LE: loop exit
PB: predicated region body
PF: predicated region fallthrough
CT: control target
= control target key end

     0   :  { %12 = vsyncpa [#allocation3], 0  ;;  %v786_v7 = vmov 0.0|0.0   ;;  %v787_v8 = vmov 0.0   ;;  %vm788_vm0 = vmmov 0   ;;  %s1171_s0 = inlined_call_operand.vmem [shape: f32[8,128], index: 0, kind: input, shape index: {}]   ;;  %s1172_s1 = inlined_call_operand.vmem [shape: f32[128,384], index: 1, kind: input, shape index: {}]   ;;  %s1173_s2 = inlined_call_operand.vmem [shape: f32[1,384], index: 2, kind: input, shape index: {}]   ;;  %s1174_s3 = inlined_call_operand.vmem [shape: f32[384,24], index: 3, kind: input, shape index: {}]   ;;  %s1175_s4 = inlined_call_operand.vmem [shape: f32[1,24], index: 4, kind: input, shape index: {}]   ;;  %s1176_s5 = inlined_call_operand.hbm [shape: f32[8,384], index: 5, kind: output, shape index: {0}]   ;;  %s1177_s6 = inlined_call_operand.hbm [shape: f32[8,128], index: 6, kind: output, shape index: {1}]  }
   0x1   :  { %v26_v0 = vld [vmem:[%s1172_s1 + $0x8] sm:$0xff]  ;;  %v29_v1 = vld [vmem:[%s1172_s1 + $0x20] sm:$0xff]  ;;  %v28_v4 = vld [vmem:[%s1172_s1 + $0x18] sm:$0xff]  ;;  %650 = vmatprep.subr.bf16.mxu1 %v786_v7  ;;  %154 = vmatprep.mubr.f32.mxu0 %v787_v8 }
   0x2   :  { %v25_v2 = vld [vmem:[%s1172_s1] sm:$0xff]  ;;  %v618_v3 = vpack.c.bf16 %v29_v1, %v26_v0  ;;  %v32_v5 = vld [vmem:[%s1172_s1 + $0x38] sm:$0xff]  ;;  %v35_v6 = vld [vmem:[%s1172_s1 + $0x50] sm:$0xff]  ;;  %580 = vmatprep.mubr.msk.f32.mxu1 %vm788_vm0, %v787_v8 }
   0x3   :  { %v620_v9 = vpack.c.bf16 %v28_v4, %v25_v2  ;;  %v622_v10 = vpack.c.bf16 %v35_v6, %v32_v5  ;;  %v31_v11 = vld [vmem:[%s1172_s1 + $0x30] sm:$0xff]  ;;  %v34_v12 = vld [vmem:[%s1172_s1 + $0x48] sm:$0xff]  ;;  %v41_v16 = vld [vmem:[%s1172_s1 + $0x80] sm:$0xff] }
   0x4   :  { %v27_v13 = vld [vmem:[%s1172_s1 + $0x10] sm:$0xff]  ;;  %619 = vmatprep.subr.bf16.mxu0 %v618_v3  ;;  %v30_v14 = vld [vmem:[%s1172_s1 + $0x28] sm:$0xff]  ;;  %v624_v17 = vpack.c.bf16 %v34_v12, %v31_v11  ;;  %v33_v19 = vld [vmem:[%s1172_s1 + $0x40] sm:$0xff] }
   0x5   :  { %v38_v15 = vld [vmem:[%s1172_s1 + $0x68] sm:$0xff]  ;;  %621 = vmatpush1.bf16.msra.mxu0 %v620_v9  ;;  %v651_v18 = vpack.c.bf16 %v30_v14, %v27_v13  ;;  %v37_v21 = vld [vmem:[%s1172_s1 + $0x60] sm:$0xff]  ;;  %v40_v22 = vld [vmem:[%s1172_s1 + $0x78] sm:$0xff] }
   0x6   :  { %623 = vmatprep.subr.bf16.mxu0 %v622_v10  ;;  %v626_v20 = vpack.c.bf16 %v41_v16, %v38_v15  ;;  %v36_v23 = vld [vmem:[%s1172_s1 + $0x58] sm:$0xff]  ;;  %v47_v26 = vld [vmem:[%s1172_s1 + $0xb0] sm:$0xff]  ;;  %v42_v28 = vld [vmem:[%s1172_s1 + $0x88] sm:$0xff]  ;;  %v628_v29 = vpack.c.bf16 %v40_v22, %v37_v21 }
   0x7   :  { %652 = vmatpush3.bf16.msra.mxu1 %v651_v18  ;;  %v654_v24 = vpack.c.bf16 %v36_v23, %v33_v19  ;;  %v44_v25 = vld [vmem:[%s1172_s1 + $0x98] sm:$0xff]  ;;  %v39_v27 = vld [vmem:[%s1172_s1 + $0x70] sm:$0xff]  ;;  %v46_v32 = vld [vmem:[%s1172_s1 + $0xa8] sm:$0xff] }
   0x8   :  { %653 = vmatprep.subr.bf16.mxu1 %v786_v7  ;;  %v630_v30 = vpack.c.bf16 %v47_v26, %v44_v25  ;;  %v43_v31 = vld [vmem:[%s1172_s1 + $0x90] sm:$0xff]  ;;  %v657_v33 = vpack.c.bf16 %v42_v28, %v39_v27  ;;  %v50_v34 = vld [vmem:[%s1172_s1 + $0xc8] sm:$0xff]  ;;  %v53_v35 = vld [vmem:[%s1172_s1 + $0xe0] sm:$0xff] }
   0x9   :  { %625 = vmatpush1.bf16.msra.mxu0 %v624_v17  ;;  %v45_v36 = vld [vmem:[%s1172_s1 + $0xa0] sm:$0xff]  ;;  %v48_v37 = vld [vmem:[%s1172_s1 + $0xb8] sm:$0xff]  ;;  %v632_v38 = vpack.c.bf16 %v46_v32, %v43_v31  ;;  %v634_v39 = vpack.c.bf16 %v53_v35, %v50_v34  ;;  %v59_v44 = vld [vmem:[%s1172_s1 + $0x110] sm:$0xff] }
   0xa   :  { %627 = vmatprep.subr.bf16.mxu0 %v626_v20  ;;  %v49_v40 = vld [vmem:[%s1172_s1 + $0xc0] sm:$0xff]  ;;  %v52_v41 = vld [vmem:[%s1172_s1 + $0xd8] sm:$0xff]  ;;  %v660_v42 = vpack.c.bf16 %v48_v37, %v45_v36  ;;  %v51_v45 = vld [vmem:[%s1172_s1 + $0xd0] sm:$0xff] }
   0xb   :  { %655 = vmatpush3.bf16.msra.mxu1 %v654_v24  ;;  %v56_v43 = vld [vmem:[%s1172_s1 + $0xf8] sm:$0xff]  ;;  %v54_v46 = vld [vmem:[%s1172_s1 + $0xe8] sm:$0xff]  ;;  %v636_v47 = vpack.c.bf16 %v52_v41, %v49_v40  ;;  %v55_v49 = vld [vmem:[%s1172_s1 + $0xf0] sm:$0xff] }
   0xc   :  { %656 = vmatprep.subr.bf16.mxu1 %v786_v7  ;;  %v638_v48 = vpack.c.bf16 %v59_v44, %v56_v43  ;;  %v58_v50 = vld [vmem:[%s1172_s1 + $0x108] sm:$0xff]  ;;  %v663_v51 = vpack.c.bf16 %v54_v46, %v51_v45  ;;  %v65_v53 = vld [vmem:[%s1172_s1 + $0x140] sm:$0xff]  ;;  %v60_v55 = vld [vmem:[%s1172_s1 + $0x118] sm:$0xff] }
   0xd   :  { %629 = vmatpush1.bf16.msra.mxu0 %v628_v29  ;;  %v62_v52 = vld [vmem:[%s1172_s1 + $0x128] sm:$0xff]  ;;  %v57_v54 = vld [vmem:[%s1172_s1 + $0x100] sm:$0xff]  ;;  %v640_v56 = vpack.c.bf16 %v58_v50, %v55_v49  ;;  %v64_v59 = vld [vmem:[%s1172_s1 + $0x138] sm:$0xff] }
   0xe   :  { %631 = vmatprep.subr.bf16.mxu0 %v630_v30  ;;  %v642_v57 = vpack.c.bf16 %v65_v53, %v62_v52  ;;  %v61_v58 = vld [vmem:[%s1172_s1 + $0x120] sm:$0xff]  ;;  %v666_v60 = vpack.c.bf16 %v60_v55, %v57_v54  ;;  %v68_v61 = vld [vmem:[%s1172_s1 + $0x158] sm:$0xff]  ;;  %v71_v62 = vld [vmem:[%s1172_s1 + $0x170] sm:$0xff] }
   0xf   :  { %658 = vmatpush3.bf16.msra.mxu1 %v657_v33  ;;  %v63_v63 = vld [vmem:[%s1172_s1 + $0x130] sm:$0xff]  ;;  %v66_v0 = vld [vmem:[%s1172_s1 + $0x148] sm:$0xff]  ;;  %v644_v1 = vpack.c.bf16 %v64_v59, %v61_v58  ;;  %v646_v2 = vpack.c.bf16 %v71_v62, %v68_v61  ;;  %v253_v6 = vld [vmem:[%s1174_s3 + $0x80] sm:$0xff] }
  0x10   :  { %659 = vmatprep.subr.bf16.mxu1 %v786_v7  ;;  %v67_v3 = vld [vmem:[%s1172_s1 + $0x150] sm:$0xff]  ;;  %v70_v4 = vld [vmem:[%s1172_s1 + $0x168] sm:$0xff]  ;;  %v669_v5 = vpack.c.bf16 %v66_v0, %v63_v63  ;;  %v69_v10 = vld [vmem:[%s1172_s1 + $0x160] sm:$0xff] }
  0x11   :  { %633 = vmatpush1.bf16.msra.mxu0 %v632_v38  ;;  %v254_v9 = vld [vmem:[%s1174_s3 + $0x88] sm:$0xff]  ;;  %v72_v11 = vld [vmem:[%s1172_s1 + $0x178] sm:$0xff]  ;;  %v648_v12 = vpack.c.bf16 %v70_v4, %v67_v3 }
  0x12   :  { %635 = vmatprep.subr.bf16.mxu0 %v634_v39 }
  0x13   :  { %661 = vmatpush3.bf16.msra.mxu1 %v660_v42 }
  0x14   :  { %662 = vmatprep.subr.bf16.mxu1 %v786_v7 }
  0x15   :  { %637 = vmatpush1.bf16.msra.mxu0 %v636_v47 }
  0x16   :  { %639 = vmatprep.subr.bf16.mxu0 %v638_v48 }
  0x17   :  { %664 = vmatpush3.bf16.msra.mxu1 %v663_v51 }
  0x18   :  { %665 = vmatprep.subr.bf16.mxu1 %v786_v7 }
  0x19   :  { %641 = vmatpush1.bf16.msra.mxu0 %v640_v56 }
  0x1a   :  { %643 = vmatprep.subr.bf16.mxu0 %v642_v57 }
  0x1b   :  { %667 = vmatpush3.bf16.msra.mxu1 %v666_v60 }
  0x1c   :  { %668 = vmatprep.subr.bf16.mxu1 %v786_v7 }
  0x1d   :  { %645 = vmatpush1.bf16.msra.mxu0 %v644_v1 }
  0x1e   :  { %13 = vsyncpa [#allocation5], 0  ;;  %647 = vmatprep.subr.bf16.mxu0 %v646_v2  ;;  %v674_v13 = vpack.c.bf16 %v254_v9, %v253_v6  ;;  %v237_v14 = vld [vmem:[%s1174_s3] sm:$0xff]  ;;  %v238_v15 = vld [vmem:[%s1174_s3 + $0x8] sm:$0xff]  ;;  %v672_v16 = vpack.c.bf16 %v72_v11, %v69_v10  ;;  %s789_s18 = smov 120   ;;  %s790_s19 = smov 112  }
  0x1f   :  { %670 = vmatpush3.bf16.msra.mxu1 %v669_v5  ;;  %v255_v17 = vld [vmem:[%s1174_s3 + $0x90] sm:$0xff]  ;;  %v256_v18 = vld [vmem:[%s1174_s3 + $0x98] sm:$0xff]  ;;  %v269_v19 = vld [vmem:[%s1174_s3 + $0x100] sm:$0xff]  ;;  %v676_v22 = vpack.c.bf16 %v238_v15, %v237_v14  ;;  %s791_s20 = smov [#allocation2]  }
  0x20   :  { %671 = vmatprep.subr.bf16.mxu1 %v786_v7  ;;  %v270_v20 = vld [vmem:[%s1174_s3 + $0x108] sm:$0xff]  ;;  %v24_v21 = vld [vmem:[%s1171_s0] sm:$0xff]  ;;  %v678_v23 = vpack.c.bf16 %v256_v18, %v255_v17  ;;  %v239_v24 = vld [vmem:[%s1174_s3 + $0x10] sm:$0xff]  ;;  %s456_s21 = sshll.u32 %s791_s20, 4  ;;  %s457_s21 = int_to_ptr.vmem [resolvable:$true] %s456_s21 }
  0x21   :  { %649 = vmatpush1.bf16.msra.mxu0 %v648_v12  ;;  %v240_v25 = vld [vmem:[%s1174_s3 + $0x18] sm:$0xff]  ;;  %v707_v26 = vpack.c.bf16 %v270_v20, %v269_v19  ;;  %v257_v27 = vld [vmem:[%s1174_s3 + $0xa0] sm:$0xff]  ;;  %v258_v28 = vld [vmem:[%s1174_s3 + $0xa8] sm:$0xff]  ;;  %s738_s0 = scalar_lea.vmem %s457_s21, 384  ;;  %p743_p1 = scmp.lt.s32.totalorder %s457_s21, %s457_s21 }
  0x22   :  { %675 = vmatprep.subr.bf16.mxu0 %v674_v13  ;;  %v271_v29 = vld [vmem:[%s1174_s3 + $0x110] sm:$0xff]  ;;  %v272_v30 = vld [vmem:[%s1174_s3 + $0x118] sm:$0xff]  ;;  %v680_v31 = vpack.c.bf16 %v240_v25, %v239_v24  ;;  %v682_v32 = vpack.c.bf16 %v258_v28, %v257_v27  ;;  %v241_v33 = vld [vmem:[%s1174_s3 + $0x20] sm:$0xff]  ;;  %p739_p0 = scmp.ne.s32.totalorder %s457_s21, %s738_s0  ;;  %p744_p2 = scmp.lt.s32.totalorder %s738_s0, %s738_s0 }
  0x23   :  { %673 = vmatpush3.bf16.msra.mxu1 %v672_v16  ;;  %v242_v34 = vld [vmem:[%s1174_s3 + $0x28] sm:$0xff]  ;;  %v710_v35 = vpack.c.bf16 %v272_v30, %v271_v29  ;;  %v259_v36 = vld [vmem:[%s1174_s3 + $0xb0] sm:$0xff]  ;;  %v260_v37 = vld [vmem:[%s1174_s3 + $0xb8] sm:$0xff] }
  0x24   :  { %155 = vmatmul.mubr.f32.vlgmr.msra.gmra.mrb[0].mxu0 %v24_v21  ;;  %706 = vmatprep.subr.bf16.mxu1 %v786_v7  ;;  %v273_v38 = vld [vmem:[%s1174_s3 + $0x120] sm:$0xff]  ;;  %v274_v39 = vld [vmem:[%s1174_s3 + $0x128] sm:$0xff]  ;;  %v684_v40 = vpack.c.bf16 %v242_v34, %v241_v33  ;;  %v686_v41 = vpack.c.bf16 %v260_v37, %v259_v36  ;;  %v243_v42 = vld [vmem:[%s1174_s3 + $0x30] sm:$0xff]  ;;  %p745_p3 = por %p744_p2, %p743_p1 }
  0x25   :  { %677 = vmatpush3.bf16.msra.mxu0 %v676_v22  ;;  %v713_v43 = vpack.c.bf16 %v274_v39, %v273_v38  ;;  %v261_v44 = vld [vmem:[%s1174_s3 + $0xc0] sm:$0xff]  ;;  %v262_v45 = vld [vmem:[%s1174_s3 + $0xc8] sm:$0xff]  ;;  %v275_v46 = vld [vmem:[%s1174_s3 + $0x130] sm:$0xff]  ;;  %v75_v22 = vlaneseq }
  0x26   :  { %581 = vmatmul.mubr.f32.vlgmr.msra.gmra.mrb[0].mxu1 %v24_v21  ;;  %679 = vmatprep.subr.bf16.mxu0 %v678_v23  ;;  %v276_v47 = vld [vmem:[%s1174_s3 + $0x138] sm:$0xff]  ;;  %v690_v49 = vpack.c.bf16 %v262_v45, %v261_v44  ;;  %v245_v50 = vld [vmem:[%s1174_s3 + $0x40] sm:$0xff]  ;;  %v246_v51 = vld [vmem:[%s1174_s3 + $0x48] sm:$0xff]  ;;  %p746_p4 = pnand %p745_p3, %p739_p0 }
  0x27   :  { %708 = vmatpush3.bf16.msra.mxu1 %v707_v26  ;;  %615 = vmatprep.mubr.msk.f32.mxu1 %vm788_vm0, %v787_v8  ;;  %v244_v8 = vld [vmem:[%s1174_s3 + $0x38] sm:$0xff]  ;;  %v716_v52 = vpack.c.bf16 %v276_v47, %v275_v46  ;;  %v263_v53 = vld [vmem:[%s1174_s3 + $0xd0] sm:$0xff]  ;;  %v277_v55 = vld [vmem:[%s1174_s3 + $0x140] sm:$0xff]  ;;  %v692_v57 = vpack.c.bf16 %v246_v51, %v245_v50  ;;  %v76_v23 = vshrl.u32 %v75_v22, 7 }
  0x28   :  { %709 = vmatprep.subr.bf16.mxu1 %v786_v7  ;;  %v688_v48 = vpack.c.bf16 %v244_v8, %v243_v42  ;;  %v264_v54 = vld [vmem:[%s1174_s3 + $0xd8] sm:$0xff]  ;;  %v278_v56 = vld [vmem:[%s1174_s3 + $0x148] sm:$0xff]  ;;  %v247_v59 = vld [vmem:[%s1174_s3 + $0x50] sm:$0xff] }
  0x29   :  { %681 = vmatpush3.bf16.msra.mxu0 %v680_v31  ;;  %v694_v58 = vpack.c.bf16 %v264_v54, %v263_v53  ;;  %v248_v60 = vld [vmem:[%s1174_s3 + $0x58] sm:$0xff]  ;;  %v719_v61 = vpack.c.bf16 %v278_v56, %v277_v55  ;;  %v265_v62 = vld [vmem:[%s1174_s3 + $0xe0] sm:$0xff]  ;;  %v266_v63 = vld [vmem:[%s1174_s3 + $0xe8] sm:$0xff]  ;;  %v77_v24 = vsub.s32 0, %v76_v23  ;;  %v81_v26 = vsub.s32 1, %v76_v23 }
  0x2a   :  { %683 = vmatprep.subr.bf16.mxu0 %v682_v32  ;;  %v696_v0 = vpack.c.bf16 %v248_v60, %v247_v59  ;;  %v698_v1 = vpack.c.bf16 %v266_v63, %v265_v62  ;;  %v249_v2 = vld [vmem:[%s1174_s3 + $0x60] sm:$0xff]  ;;  %v250_v3 = vld [vmem:[%s1174_s3 + $0x68] sm:$0xff]  ;;  %v279_v4 = vld [vmem:[%s1174_s3 + $0x150] sm:$0xff]  ;;  %v85_v27 = vsub.s32 2, %v76_v23 }
  0x2b   :  { %711 = vmatpush3.bf16.msra.mxu1 %v710_v35  ;;  %v700_v5 = vpack.c.bf16 %v250_v3, %v249_v2  ;;  %v280_v6 = vld [vmem:[%s1174_s3 + $0x158] sm:$0xff]  ;;  %v267_v10 = vld [vmem:[%s1174_s3 + $0xf0] sm:$0xff]  ;;  %v281_v15 = vld [vmem:[%s1174_s3 + $0x160] sm:$0xff] }
  0x2c   :  { %712 = vmatprep.subr.bf16.mxu1 %v786_v7  ;;  %v722_v9 = vpack.c.bf16 %v280_v6, %v279_v4  ;;  %v268_v11 = vld [vmem:[%s1174_s3 + $0xf8] sm:$0xff]  ;;  %v251_v13 = vld [vmem:[%s1174_s3 + $0x70] sm:$0xff]  ;;  %v282_v17 = vld [vmem:[%s1174_s3 + $0x168] sm:$0xff] }
  0x2d   :  { %685 = vmatpush3.bf16.msra.mxu0 %v684_v40  ;;  %v702_v12 = vpack.c.bf16 %v268_v11, %v267_v10  ;;  %v252_v14 = vld [vmem:[%s1174_s3 + $0x78] sm:$0xff]  ;;  %v725_v18 = vpack.c.bf16 %v282_v17, %v281_v15  ;;  %v283_v19 = vld [vmem:[%s1174_s3 + $0x170] sm:$0xff]  ;;  %v73_v25 = vld [vmem:[%s1173_s2] sm:$0x7] }
  0x2e   :  { %687 = vmatprep.subr.bf16.mxu0 %v686_v41  ;;  %v704_v16 = vpack.c.bf16 %v252_v14, %v251_v13  ;;  %v284_v20 = vld [vmem:[%s1174_s3 + $0x178] sm:$0xff]  ;;  %v78_v28 = vrot.slane %v73_v25, %v77_v24  ;;  %v82_v29 = vrot.slane %v73_v25, %v81_v26  ;;  %v86_v30 = vrot.slane %v73_v25, %v85_v27  ;;  %v478_v8 = vld [vmem:[%s1175_s4] ss:$0 sm:$0xff] }
  0x2f   :  { %714 = vmatpush3.bf16.msra.mxu1 %v713_v43  ;;  %v728_v21 = vpack.c.bf16 %v284_v20, %v283_v19 }
  0x30   :  { %715 = vmatprep.subr.bf16.mxu1 %v786_v7 }
  0x31   :  { %689 = vmatpush3.bf16.msra.mxu0 %v688_v48 }
  0x32   :  { %691 = vmatprep.subr.bf16.mxu0 %v690_v49 }
  0x33   :  { %717 = vmatpush3.bf16.msra.mxu1 %v716_v52 }
  0x34   :  { %718 = vmatprep.subr.bf16.mxu1 %v786_v7 }
  0x35   :  { %693 = vmatpush3.bf16.msra.mxu0 %v692_v57 }
  0x36   :  { %695 = vmatprep.subr.bf16.mxu0 %v694_v58 }
  0x37   :  { %720 = vmatpush3.bf16.msra.mxu1 %v719_v61 }
  0x38   :  { %721 = vmatprep.subr.bf16.mxu1 %v786_v7 }
  0x39   :  { %697 = vmatpush3.bf16.msra.mxu0 %v696_v0 }
  0x3a   :  { %699 = vmatprep.subr.bf16.mxu0 %v698_v1 }
  0x3b   :  { %723 = vmatpush3.bf16.msra.mxu1 %v722_v9 }
  0x3c   :  { %724 = vmatprep.subr.bf16.mxu1 %v786_v7 }
  0x3d   :  { %701 = vmatpush3.bf16.msra.mxu0 %v700_v5 }
  0x3e   :  { %703 = vmatprep.subr.bf16.mxu0 %v702_v12 }
  0x3f   :  { %726 = vmatpush3.bf16.msra.mxu1 %v725_v18 }
  0x40   :  { %727 = vmatprep.subr.bf16.mxu1 %v786_v7 }
  0x41   :  { %705 = vmatpush3.bf16.msra.mxu0 %v704_v16 }
  0x43   :  { %729 = vmatpush3.bf16.msra.mxu1 %v728_v21 }
  0xf7   :  { %v156_v31 = vpop.f32.mrb[0].mxu0 }
  0xf8   :  { %v157_v32 = vadd.f32 %v156_v31, %v78_v28  ;;  %v158_v33 = vpop.f32.mrb[1].mxu0 }
  0xf9   :  { %v159_v34 = vadd.f32 %v158_v33, %v82_v29  ;;  %v227_v35 = vpop.f32.mrb[0].mxu1 }
  0xfa   :  { %v231_v7 = vmax.f32 %v157_v32, 0.0  ;;  %v228_v36 = vadd.f32 %v227_v35, %v86_v30  ;;  %v582_v37 = vpop.f32.mrb[1].mxu1 }
  0xfb   :  { %v232_v38 = vmax.f32 %v159_v34, 0.0 }
  0xfc   :  { %234 = vst [vmem:[#allocation2] sm:$0xff] %v231_v7  ;;  %v233_v39 = vmax.f32 %v228_v36, 0.0 }
  0xfd   :  { %235 = vst [vmem:[#allocation2 + $0x8] sm:$0xff] %v232_v38  ;;  %356 = vmatprep.mubr.f32.mxu0 %v232_v38 }
  0xfe   :  { %236 = vst [vmem:[#allocation2 + $0x10] sm:$0xff] %v233_v39  ;;  %357 = vmatmul.mubr.f32.vlgmr.msra.gmra.mrb[2].mxu0 %v231_v7  ;;  %616 = vmatmul.mubr.f32.vlgmr.msra.gmra.mrb[2].mxu1 %v233_v39 }
 0x1d1   :  { %v528_v40 = vpop.f32.mrb[2].mxu0  ;;  %v428_v41 = vpop.f32.mrb[2].mxu1 }
 0x1d2   :  { %v529_v42 = vpop.f32.mrb[3].mxu0  ;;  %v617_v43 = vpop.f32.mrb[3].mxu1 }
 0x1d3   :  { %v530_v44 = vadd.f32 %v529_v42, %v528_v40 }
 0x1d5   :  { %v359_v45 = vadd.f32 %v530_v44, %v478_v8 }
 0x1d7   :  { %v429_v46 = vadd.f32 %v428_v41, %v359_v45 }
 0x1d9   :  { %433 = vrot.lane.b32.xlu0 %v429_v46, %s789_s18 }
 0x1dd   :  { %437 = vrot.lane.b32.xlu0 %v429_v46, %s790_s19 }
 0x1de   :  { %749 = shalt.err (!%p746_p4)
}
 0x1df   :  { %s750_s23 = scalar_lea.hbm %s1176_s5, 384 }
 0x1e0   :  { %p751_p5 = scmp.ne.s32.totalorder %s1176_s5, %s750_s23  ;;  %p754_p6 = scmp.lt.u32.totalorder %s750_s23, %s1176_s5 }
 0x1e2   :  { %p756_p7 = pnand %p754_p6, %p751_p5 }
 0x1e4   :  { %759 = shalt.err (!%p756_p7)
}
 0x1e5   :  { %459 = dma.vmem_to_hbm [thread:$0]  %s457_s21, 384, %s1176_s5, [#allocation3]   ;;  %vm445_vm1 = vcmask 195584   ;;  %vm447_vm2 = vcmask 261120  }
 0x1e6   :  { %s792_s30 = smov 24   ;;  %s793_s1 = smov [#allocation4]  }
 0x1e7   :  { %s466_s7 = sshll.u32 %s793_s1, 4  ;;  %s467_s7 = int_to_ptr.vmem [resolvable:$true] %s466_s7 }
 0x1e8   :  { %s760_s8 = scalar_lea.vmem %s467_s7, 128  ;;  %p765_p9 = scmp.lt.s32.totalorder %s467_s7, %s467_s7 }
 0x1e9   :  { %p761_p8 = scmp.ne.s32.totalorder %s467_s7, %s760_s8  ;;  %p766_p10 = scmp.lt.s32.totalorder %s760_s8, %s760_s8 }
 0x1eb   :  { %p767_p11 = por %p766_p10, %p765_p9 }
 0x1ed   :  { %p768_p12 = pnand %p767_p11, %p761_p8 }
 0x24b   :  { %v434_v47 = vpop.permute.xlu0 %433 }
 0x24c   :  { %v436_v48 = vadd.f32 %v434_v47, %v429_v46 }
 0x24f   :  { %v438_v49 = vpop.permute.xlu0 %437 }
 0x250   :  { %v440_v50 = vadd.f32 %v438_v49, %v436_v48 }
 0x252   :  { %442 = vrot.lane.b32.xlu1 %v440_v50, %s792_s30 }
 0x2c4   :  { %v443_v51 = vpop.permute.xlu1 %442 }
 0x2c5   :  { %v446_v52 = vsel %vm445_vm1, %v429_v46, %v443_v51 }
 0x2c6   :  { %v448_v53 = vsel %vm447_vm2, %v446_v52, 0.0 }
 0x2c7   :  { %449 = vst [vmem:[#allocation4] sm:$0xff] %v448_v53 }
 0x2c8   :  { %771 = shalt.err (!%p768_p12)
}
 0x2c9   :  { %s772_s10 = scalar_lea.hbm %s1177_s6, 128 }
 0x2ca   :  { %p773_p13 = scmp.ne.s32.totalorder %s1177_s6, %s772_s10  ;;  %p776_p0 = scmp.lt.u32.totalorder %s772_s10, %s1177_s6 }
 0x2cc   :  { %p778_p1 = pnand %p776_p0, %p773_p13 }
 0x2ce   :  { %781 = shalt.err (!%p778_p1)
}
 0x2cf   :  { %469 = dma.vmem_to_hbm [thread:$0]  %s467_s7, 128, %s1177_s6, [#allocation5]  }
 0x2d0   :  { %782 = dma.done.wait [#allocation3], 384  }
 0x2d1   :  { %783 = vsyncadd [#allocation3], 4294966912 }
 0x2d2   :  { %784 = dma.done.wait [#allocation5], 128  }
 0x2d3   :  { %785 = vsyncadd [#allocation5], 4294967168 }
 0x2d4   :  { %476 = vsyncpa [#allocation3], 1 }
 0x2d5   :  { %477 = vsyncpa [#allocation5], 1 }

</bundles_post_ra>
